<compile_context>
chip_gen: v5e
topology: v5e:2x2
jax: 0.10.0
libtpu: 0.0.40
codegen_flags: <defaults>
</compile_context>

<pallas_src>
import functools

import numpy as np
import jax
import jax.numpy as jnp
from jax.experimental import pallas as pl
from jax.experimental.pallas import tpu as pltpu


# ----------------------------------------------------------------------------
# Pallas kernel: per (batch, row-tile) step, emit all s*s output phase blocks.
# ----------------------------------------------------------------------------
def _contract_kernel(x_ref, sel_ref, o_ref, *, s, w, n_split):
    a = x_ref[0]                                    # (TR, s*w)
    for i in range(s):                              # static unroll over i-phase
        ai = a[:, i * w:(i + 1) * w]                # (TR, w) i-block slice
        if n_split == 1:
            parts = (ai.astype(jnp.bfloat16),)
        else:
            # Split into bf16 terms so the MXU matmuls reconstruct the value:
            # 2 terms ~2^-17 rel err (exact for f16), 3 terms exact to 24 bits.
            parts = []
            rem = ai.astype(jnp.float32)
            for t in range(n_split):
                p = rem.astype(jnp.bfloat16)
                parts.append(p)
                if t + 1 < n_split:
                    rem = rem - p.astype(jnp.float32)
        for j in range(s):                          # static unroll over j-phase
            sel = sel_ref[j]                        # (w, ws) 0/1 selector (bf16)
            acc = jnp.dot(parts[0], sel, preferred_element_type=jnp.float32)
            for part in parts[1:]:
                acc = acc + jnp.dot(part, sel, preferred_element_type=jnp.float32)
            o_ref[0, i * s + j, :, :] = acc.astype(o_ref.dtype)


def _make_selectors(s, w):
    """(s, w, w//s) with sel[j, wo*s + j, wo] = 1 (stride-s lane de-interleave)."""
    ws = w // s
    sel = np.zeros((s, w, ws), dtype=np.float32)
    wo = np.arange(ws)
    for j in range(s):
        sel[j, wo * s + j, wo] = 1.0
    return sel


def _pick_row_tile(rows, bytes_per_row, max_tile, budget, want_two_tiles):
    """Pick a row tile (multiple of 8, VMEM-budgeted).  Returns (tile, padded_rows)."""
    cap = budget // max(int(bytes_per_row), 1)
    cap = max(8, min(int(max_tile), (cap // 8) * 8))
    if want_two_tiles and rows >= 16:               # keep both v7x cores busy
        cap = min(cap, max(8, (rows // 2 // 8) * 8))
    if rows <= cap:
        return rows, rows                           # single full-rows block
    t = cap
    while t >= 128:                                 # prefer large exact divisors
        if rows % t == 0:
            return t, rows
        t -= 8
    padded = ((rows + cap - 1) // cap) * cap        # pad; extra rows sliced off
    return cap, padded


# ----------------------------------------------------------------------------
# Public wrapper: Contract.forward
# ----------------------------------------------------------------------------
def contract(x, gain=2, max_row_tile=512, vmem_budget=26 << 20):
    b, c, h, w = x.shape
    s = int(gain)
    assert s >= 1 and h % s == 0 and w % s == 0, "spatial dims must divide gain"
    if s == 1:
        return x
    hs, ws = h // s, w // s
    rows = c * hs
    n_phase = s * s
    in_dt = x.dtype
    in_bytes = in_dt.itemsize

    if in_dt == jnp.bfloat16:
        n_split = 1                                  # single matmul per phase
    elif jnp.issubdtype(in_dt, jnp.floating):
        n_split = 2                                  # f32 (~8e-6 rel) / f16 (exact)
    else:
        n_split = 3                                  # ints: exact up to 2^24

    # Per-row VMEM cost: double-buffered in/out slabs + in-kernel temporaries.
    bytes_per_row = (2 * s * w * in_bytes            # input slab (x2 buffers)
                     + 2 * s * w * in_bytes          # output slab (x2 buffers)
                     + s * w * 4                     # f32 working copy
                     + (n_split + 1) * w * 2         # bf16 split terms
                     + s * ws * 4)                   # f32 accumulators
    tr, padded_rows = _pick_row_tile(rows, bytes_per_row, max_row_tile,
                                     vmem_budget, want_two_tiles=(b == 1))

    x2 = x.reshape(b, rows, s * w)                   # free row-major reshape
    if padded_rows != rows:
        x2 = jnp.pad(x2, ((0, 0), (0, padded_rows - rows), (0, 0)))

    sel = jnp.asarray(_make_selectors(s, w), dtype=jnp.bfloat16)
    sel_bytes = int(sel.size) * 2

    kernel = functools.partial(_contract_kernel, s=s, w=w, n_split=n_split)

    flops = 2 * b * padded_rows * n_phase * w * ws * n_split
    bytes_accessed = (b * padded_rows * s * w * in_bytes        # one HBM read
                      + b * n_phase * padded_rows * ws * in_bytes  # one HBM write
                      + sel_bytes)
    vmem_limit = int(min(max(tr * bytes_per_row + sel_bytes + (4 << 20),
                             16 << 20), 56 << 20))

    out = pl.pallas_call(
        kernel,
        out_shape=jax.ShapeDtypeStruct((b, n_phase, padded_rows, ws), in_dt),
        grid=(b, padded_rows // tr),
        in_specs=[
            # activation slab
            pl.BlockSpec((1, tr, s * w), lambda bi, ri: (bi, ri, 0)),
            # constant 0/1 selectors: fetched once, single-buffered
            pl.BlockSpec((s, w, ws), lambda bi, ri: (0, 0, 0),
                         pipeline_mode=pl.Buffered(buffer_count=1)),
        ],
        out_specs=pl.BlockSpec((1, n_phase, tr, ws),
                               lambda bi, ri: (bi, 0, ri, 0)),
        compiler_params=pltpu.CompilerParams(
            dimension_semantics=("parallel", "parallel"),
            vmem_limit_bytes=vmem_limit),
        cost_estimate=pl.CostEstimate(flops=flops, transcendentals=0,
                                      bytes_accessed=bytes_accessed),
    )(x2, sel)

    if padded_rows != rows:
        out = out[:, :, :rows, :]
    # (b, s*s, c*hs, ws) -> (b, c*s*s, hs, ws) is a free row-major reshape.
    return out.reshape(b, c * s * s, hs, ws)


# ----------------------------------------------------------------------------
# Pure-JAX reference mirroring the PyTorch module exactly
# ----------------------------------------------------------------------------
def contract_reference(x, gain=2):
    b, c, h, w = x.shape
    s = gain
    y = x.reshape(b, c, h // s, s, w // s, s)
    y = jnp.transpose(y, (0, 3, 5, 1, 2, 4))
    return y.reshape(b, c * s * s, h // s, w // s)


if __name__ == "__main__":
    key = jax.random.PRNGKey(0)
    N, C, H, W = 2, 4, 16, 16
    x = jax.random.normal(key, (N, C, H, W), jnp.float32)

    run = jax.jit(functools.partial(contract, gain=2))
    out = jax.block_until_ready(run(x))
    ref = jax.block_until_ready(contract_reference(x, gain=2))

    assert out.shape == (N, C * 4, H // 2, W // 2)
    max_err = float(jnp.max(jnp.abs(out - ref)))
    assert jnp.allclose(out, ref, rtol=1e-4, atol=1e-4), f"max abs err {max_err}"

    print("KERNEL_OK")
</pallas_src>

<mosaic_0001>
module attributes {stable_mosaic.version = 11 : i64} {
  func.func @_contract_kernel(%arg0: i32, %arg1: i32, %arg2: memref<1x32x32xf32, #tpu.memory_space<vmem>>, %arg3: memref<2x16x8xbf16, #tpu.memory_space<vmem>>, %arg4: memref<1x4x32x8xf32, #tpu.memory_space<vmem>>) attributes {dimension_semantics = [#tpu.dimension_semantics<parallel>, #tpu.dimension_semantics<parallel>], iteration_bounds = array<i64: 2, 1>, scalar_prefetch = 0 : i64, scratch_operands = 0 : i64, tpu.core_type = #tpu.core_type<tc>, window_params = [{transform_indices = @transform_0, window_bounds = array<i64: 1, 32, 32>}, {pipeline_mode = #tpu.pipeline_mode<synchronous>, transform_indices = @transform_1, window_bounds = array<i64: 2, 16, 8>}, {transform_indices = @transform_2, window_bounds = array<i64: 1, 4, 32, 8>}]} {
    %c0 = arith.constant 0 : index
    %c0_0 = arith.constant 0 : index
    %c0_1 = arith.constant 0 : index
    %0 = vector.load %arg2[%c0, %c0_0, %c0_1] : memref<1x32x32xf32, #tpu.memory_space<vmem>>, vector<1x32x32xf32>
    %1 = vector.shape_cast %0 : vector<1x32x32xf32> to vector<32x32xf32>
    %2 = vector.extract_strided_slice %1 {offsets = [0, 0], sizes = [32, 16], strides = [1, 1]} : vector<32x32xf32> to vector<32x16xf32>
    %3 = arith.truncf %2 : vector<32x16xf32> to vector<32x16xbf16>
    %4 = arith.extf %3 : vector<32x16xbf16> to vector<32x16xf32>
    %5 = arith.subf %2, %4 : vector<32x16xf32>
    %6 = arith.truncf %5 : vector<32x16xf32> to vector<32x16xbf16>
    %c0_2 = arith.constant 0 : index
    %c0_3 = arith.constant 0 : index
    %c0_4 = arith.constant 0 : index
    %7 = vector.load %arg3[%c0_2, %c0_3, %c0_4] : memref<2x16x8xbf16, #tpu.memory_space<vmem>>, vector<1x16x8xbf16>
    %8 = vector.shape_cast %7 : vector<1x16x8xbf16> to vector<16x8xbf16>
    %cst = arith.constant dense<0.000000e+00> : vector<32x8xf32>
    %9 = tpu.matmul %3, %8, %cst {dimension_numbers = #tpu.dot_dimension_numbers<[1], [0], [0], [1], [0, 0, 1, 1], [], []>} : vector<32x16xbf16>, vector<16x8xbf16>, vector<32x8xf32> -> vector<32x8xf32>
    %cst_5 = arith.constant dense<0.000000e+00> : vector<32x8xf32>
    %10 = tpu.matmul %6, %8, %cst_5 {dimension_numbers = #tpu.dot_dimension_numbers<[1], [0], [0], [1], [0, 0, 1, 1], [], []>} : vector<32x16xbf16>, vector<16x8xbf16>, vector<32x8xf32> -> vector<32x8xf32>
    %11 = arith.addf %9, %10 : vector<32x8xf32>
    %c0_6 = arith.constant 0 : index
    %c0_7 = arith.constant 0 : index
    %c0_8 = arith.constant 0 : index
    %c0_9 = arith.constant 0 : index
    %12 = vector.load %arg4[%c0_6, %c0_7, %c0_8, %c0_9] : memref<1x4x32x8xf32, #tpu.memory_space<vmem>>, vector<1x1x32x8xf32>
    %13 = vector.shape_cast %12 : vector<1x1x32x8xf32> to vector<32x8xf32>
    %14 = vector.shape_cast %11 : vector<32x8xf32> to vector<1x1x32x8xf32>
    tpu.vector_store %arg4[%c0_6, %c0_7, %c0_8, %c0_9], %14 {strides = array<i32>} : memref<1x4x32x8xf32, #tpu.memory_space<vmem>>, vector<1x1x32x8xf32>,
    %c1 = arith.constant 1 : index
    %c0_10 = arith.constant 0 : index
    %c0_11 = arith.constant 0 : index
    %15 = vector.load %arg3[%c1, %c0_10, %c0_11] : memref<2x16x8xbf16, #tpu.memory_space<vmem>>, vector<1x16x8xbf16>
    %16 = vector.shape_cast %15 : vector<1x16x8xbf16> to vector<16x8xbf16>
    %cst_12 = arith.constant dense<0.000000e+00> : vector<32x8xf32>
    %17 = tpu.matmul %3, %16, %cst_12 {dimension_numbers = #tpu.dot_dimension_numbers<[1], [0], [0], [1], [0, 0, 1, 1], [], []>} : vector<32x16xbf16>, vector<16x8xbf16>, vector<32x8xf32> -> vector<32x8xf32>
    %cst_13 = arith.constant dense<0.000000e+00> : vector<32x8xf32>
    %18 = tpu.matmul %6, %16, %cst_13 {dimension_numbers = #tpu.dot_dimension_numbers<[1], [0], [0], [1], [0, 0, 1, 1], [], []>} : vector<32x16xbf16>, vector<16x8xbf16>, vector<32x8xf32> -> vector<32x8xf32>
    %19 = arith.addf %17, %18 : vector<32x8xf32>
    %c0_14 = arith.constant 0 : index
    %c1_15 = arith.constant 1 : index
    %c0_16 = arith.constant 0 : index
    %c0_17 = arith.constant 0 : index
    %20 = vector.load %arg4[%c0_14, %c1_15, %c0_16, %c0_17] : memref<1x4x32x8xf32, #tpu.memory_space<vmem>>, vector<1x1x32x8xf32>
    %21 = vector.shape_cast %20 : vector<1x1x32x8xf32> to vector<32x8xf32>
    %22 = vector.shape_cast %19 : vector<32x8xf32> to vector<1x1x32x8xf32>
    tpu.vector_store %arg4[%c0_14, %c1_15, %c0_16, %c0_17], %22 {strides = array<i32>} : memref<1x4x32x8xf32, #tpu.memory_space<vmem>>, vector<1x1x32x8xf32>,
    %23 = vector.extract_strided_slice %1 {offsets = [0, 16], sizes = [32, 16], strides = [1, 1]} : vector<32x32xf32> to vector<32x16xf32>
    %24 = arith.truncf %23 : vector<32x16xf32> to vector<32x16xbf16>
    %25 = arith.extf %24 : vector<32x16xbf16> to vector<32x16xf32>
    %26 = arith.subf %23, %25 : vector<32x16xf32>
    %27 = arith.truncf %26 : vector<32x16xf32> to vector<32x16xbf16>
    %c0_18 = arith.constant 0 : index
    %c0_19 = arith.constant 0 : index
    %c0_20 = arith.constant 0 : index
    %28 = vector.load %arg3[%c0_18, %c0_19, %c0_20] : memref<2x16x8xbf16, #tpu.memory_space<vmem>>, vector<1x16x8xbf16>
    %29 = vector.shape_cast %28 : vector<1x16x8xbf16> to vector<16x8xbf16>
    %cst_21 = arith.constant dense<0.000000e+00> : vector<32x8xf32>
    %30 = tpu.matmul %24, %29, %cst_21 {dimension_numbers = #tpu.dot_dimension_numbers<[1], [0], [0], [1], [0, 0, 1, 1], [], []>} : vector<32x16xbf16>, vector<16x8xbf16>, vector<32x8xf32> -> vector<32x8xf32>
    %cst_22 = arith.constant dense<0.000000e+00> : vector<32x8xf32>
    %31 = tpu.matmul %27, %29, %cst_22 {dimension_numbers = #tpu.dot_dimension_numbers<[1], [0], [0], [1], [0, 0, 1, 1], [], []>} : vector<32x16xbf16>, vector<16x8xbf16>, vector<32x8xf32> -> vector<32x8xf32>
    %32 = arith.addf %30, %31 : vector<32x8xf32>
    %c0_23 = arith.constant 0 : index
    %c2 = arith.constant 2 : index
    %c0_24 = arith.constant 0 : index
    %c0_25 = arith.constant 0 : index
    %33 = vector.load %arg4[%c0_23, %c2, %c0_24, %c0_25] : memref<1x4x32x8xf32, #tpu.memory_space<vmem>>, vector<1x1x32x8xf32>
    %34 = vector.shape_cast %33 : vector<1x1x32x8xf32> to vector<32x8xf32>
    %35 = vector.shape_cast %32 : vector<32x8xf32> to vector<1x1x32x8xf32>
    tpu.vector_store %arg4[%c0_23, %c2, %c0_24, %c0_25], %35 {strides = array<i32>} : memref<1x4x32x8xf32, #tpu.memory_space<vmem>>, vector<1x1x32x8xf32>,
    %c1_26 = arith.constant 1 : index
    %c0_27 = arith.constant 0 : index
    %c0_28 = arith.constant 0 : index
    %36 = vector.load %arg3[%c1_26, %c0_27, %c0_28] : memref<2x16x8xbf16, #tpu.memory_space<vmem>>, vector<1x16x8xbf16>
    %37 = vector.shape_cast %36 : vector<1x16x8xbf16> to vector<16x8xbf16>
    %cst_29 = arith.constant dense<0.000000e+00> : vector<32x8xf32>
    %38 = tpu.matmul %24, %37, %cst_29 {dimension_numbers = #tpu.dot_dimension_numbers<[1], [0], [0], [1], [0, 0, 1, 1], [], []>} : vector<32x16xbf16>, vector<16x8xbf16>, vector<32x8xf32> -> vector<32x8xf32>
    %cst_30 = arith.constant dense<0.000000e+00> : vector<32x8xf32>
    %39 = tpu.matmul %27, %37, %cst_30 {dimension_numbers = #tpu.dot_dimension_numbers<[1], [0], [0], [1], [0, 0, 1, 1], [], []>} : vector<32x16xbf16>, vector<16x8xbf16>, vector<32x8xf32> -> vector<32x8xf32>
    %40 = arith.addf %38, %39 : vector<32x8xf32>
    %c0_31 = arith.constant 0 : index
    %c3 = arith.constant 3 : index
    %c0_32 = arith.constant 0 : index
    %c0_33 = arith.constant 0 : index
    %41 = vector.load %arg4[%c0_31, %c3, %c0_32, %c0_33] : memref<1x4x32x8xf32, #tpu.memory_space<vmem>>, vector<1x1x32x8xf32>
    %42 = vector.shape_cast %41 : vector<1x1x32x8xf32> to vector<32x8xf32>
    %43 = vector.shape_cast %40 : vector<32x8xf32> to vector<1x1x32x8xf32>
    tpu.vector_store %arg4[%c0_31, %c3, %c0_32, %c0_33], %43 {strides = array<i32>} : memref<1x4x32x8xf32, #tpu.memory_space<vmem>>, vector<1x1x32x8xf32>,
    return
  }
  func.func @transform_0(%arg0: i32, %arg1: i32) -> (i32, i32, i32) {
    %c0_i32 = arith.constant 0 : i32
    %c0_i32_0 = arith.constant 0 : i32
    return %arg0, %arg1, %c0_i32 : i32, i32, i32
  }
  func.func @transform_1(%arg0: i32, %arg1: i32) -> (i32, i32, i32) {
    %c0_i32 = arith.constant 0 : i32
    %c0_i32_0 = arith.constant 0 : i32
    %c0_i32_1 = arith.constant 0 : i32
    %c0_i32_2 = arith.constant 0 : i32
    return %c0_i32, %c0_i32_0, %c0_i32_1 : i32, i32, i32
  }
  func.func @transform_2(%arg0: i32, %arg1: i32) -> (i32, i32, i32, i32) {
    %c0_i32 = arith.constant 0 : i32
    %c0_i32_0 = arith.constant 0 : i32
    %c0_i32_1 = arith.constant 0 : i32
    return %arg0, %c0_i32, %arg1, %c0_i32_0 : i32, i32, i32, i32
  }
}

</mosaic_0001>

<bundles_post_ra>
// kernel: contract.1
= control target key start
LH: loop header
LB: loop body
LE: loop exit
PB: predicated region body
PF: predicated region fallthrough
CT: control target
= control target key end

     0   :  { %s669_s9 = smov 0   ;;  %s671_s10 = smov 0   ;;  %s768_s0 = inlined_call_operand.vmem [shape: f32[2,32,32], index: 0, kind: input, shape index: {}]   ;;  %s769_s1 = inlined_call_operand.vmem [shape: bf16[2,16,8], index: 1, kind: input, shape index: {}]   ;;  %s770_s2 = inlined_call_operand.vmem [shape: f32[2,4,32,8], index: 2, kind: output, shape index: {}]  }
   0x1   :  { %s673_s11 = smov 0  }
   0x2 LB: > { %s24_s12 = sadd.s32 1, %s647_s10  ;;  %p543_p0 = scmp.ge.s32.totalorder %s651_s11, 1  ;;  %s651_s11 = sphi %s673_s11, %s12_s11   ;;  %s647_s10 = sphi %s671_s10, %s772_s10   ;;  %s643_s9 = sphi %s669_s9, %s771_s9  }
   0x3   : > { %p26_p1 = scmp.ge.s32.totalorder %s24_s12, 2  ;;  %p133_p2 = scmp.lt.s32.totalorder %s651_s11, 3 }
   0x5   : > { %s774_s12 = smov (%p26_p1, %s24_s12), 0  ;;  %p134_p3 = pnand %p543_p0, %p133_p2 }
   0x6   : > { %p164_p4 = scmp.lt.s32.totalorder (!%p134_p3), %s643_s9, 1  ;;  %s653_s25 = smov (!%p134_p3), 112  }
   0x7   : > { %137 = sbr.rel (%p134_p3) target bundleno = 306 (0x132), region = 28 }
   0xc   : > { %v600_v0 = vld [vmem:[%s769_s1] sm:$0xff]  ;;  %v601_v1 = vld [vmem:[%s769_s1 + $0x8] sm:$0xff]  ;;  %s776_s9 = smov (!%p164_p4, %s643_s9), 1  ;;  %vm210_vm0 = vcmask 130048   ;;  %vm271_vm1 = vcmask 64512  }
   0xd   : > { %v603_v2 = vld [vmem:[%s769_s1 + $0x8] sm:$0xff]  ;;  %v602_v3 = vld [vmem:[%s769_s1] sm:$0xff]  ;;  %224 = vmatpush.bf16.msra.mxu0 %v600_v0  ;;  %292 = vmatpush.bf16.msra.mxu2 %v601_v1  ;;  %s598_s21 = sshll.u32 %s776_s9, 5  ;;  %s599_s26 = sshll.u32 %s776_s9, 7 }
   0xe   : > { %311 = vmatpush.bf16.msra.mxu3 %v601_v1  ;;  %259 = vmatpush.bf16.msra.mxu1 %v600_v0  ;;  %s171_s24 = scalar_lea.vmem %s768_s0, %s598_s21  ;;  %s721_s29 = scalar_lea.vmem %s770_s2, %s599_s26 }
   0xf   : > { %v184_v4 = vld [vmem:[%s171_s24] sm:$0xff]  ;;  %v185_v5 = vld [vmem:[%s171_s24 + $0x8] sm:$0xff]  ;;  %v186_v6 = vld [vmem:[%s171_s24 + $0x10] sm:$0xff] }
  0x10   : > { %v188_v7 = vpack.c.bf16 %v184_v4, %v184_v4  ;;  %v189_v8 = vpack.c.bf16 %v185_v5, %v185_v5  ;;  %v187_v9 = vld [vmem:[%s171_s24 + $0x18] sm:$0xff]  ;;  %v190_v10 = vpack.c.bf16 %v186_v6, %v186_v6 }
  0x11   : > { %416 = vmatpush.bf16.msrb.mxu2 %v603_v2  ;;  %355 = vmatpush.bf16.msrb.mxu0 %v602_v3  ;;  %v191_v11 = vpack.c.bf16 %v187_v9, %v187_v9 }
  0x12   : > { %435 = vmatpush.bf16.msrb.mxu3 %v603_v2  ;;  %384 = vmatpush.bf16.msrb.mxu1 %v602_v3  ;;  %v192_v12 = vunpack.c.l.bf16 %v188_v7  ;;  %v193_v13 = vunpack.c.l.bf16 %v189_v8  ;;  %v240_v14 = vunpack.c.l.b16 %v188_v7  ;;  %v241_v15 = vunpack.c.l.b16 %v189_v8 }
  0x13   : > { %v194_v16 = vunpack.c.l.bf16 %v190_v10  ;;  %v195_v17 = vunpack.c.l.bf16 %v191_v11  ;;  %v242_v25 = vunpack.c.l.b16 %v190_v10  ;;  %v243_v26 = vunpack.c.l.b16 %v191_v11 }
  0x14   : > { %v196_v18 = vsub.f32 %v184_v4, %v192_v12  ;;  %v197_v19 = vsub.f32 %v185_v5, %v193_v13  ;;  %v244_v20 = vpack.c.b16 %v241_v15, %v240_v14 }
  0x15   : > { %v198_v21 = vsub.f32 %v186_v6, %v194_v16  ;;  %v199_v22 = vsub.f32 %v187_v9, %v195_v17  ;;  %v245_v27 = vpack.c.b16 %v243_v26, %v242_v25 }
  0x16   : > { %v200_v23 = vpack.c.bf16 %v197_v19, %v196_v18  ;;  %564 = vmatmul.msk.bf16.vlgmr.msra.gmra.mxu3 %vm210_vm0, %v244_v20  ;;  %554 = vmatmul.msk.bf16.vlgmr.msra.gmra.mxu1 %vm210_vm0, %v244_v20 }
  0x17   : > { %v201_v24 = vpack.c.bf16 %v199_v22, %v198_v21 }
  0x18   : > { %332 = vrot.lane.b32.xlu0 %v200_v23, %s653_s25  ;;  %552 = vmatmul.msk.bf16.vlgmr.msra.gmra.mxu0 %vm210_vm0, %v200_v23 }
  0x19   : > { %334 = vrot.lane.b32.xlu1 %v201_v24, %s653_s25  ;;  %562 = vmatmul.msk.bf16.vlgmr.msra.gmra.mxu2 %vm210_vm0, %v200_v23 }
  0x20   : > { %367 = vrot.lane.b32.xlu0 %v244_v20, %s653_s25 }
  0x21   : > { %369 = vrot.lane.b32.xlu1 %v245_v27, %s653_s25 }
  0x26   : > { %565 = vmatmul.msk.bf16.gmra.mxu3 %vm210_vm0, %v245_v27  ;;  %555 = vmatmul.msk.bf16.gmra.mxu1 %vm210_vm0, %v245_v27 }
  0x28   : > { %553 = vmatmul.msk.bf16.gmra.mxu0 %vm210_vm0, %v201_v24 }
  0x29   : > { %563 = vmatmul.msk.bf16.gmra.mxu2 %vm210_vm0, %v201_v24 }
  0x8a   : > { %v333_v28 = vpop.permute.xlu0 %332 }
  0x8b   : > { %574 = vmatmul.msk.bf16.vlgmr.msrb.gmra.mxu0 %vm210_vm0, %v333_v28  ;;  %588 = vmatmul.msk.bf16.vlgmr.msrb.gmra.mxu2 %vm210_vm0, %v333_v28  ;;  %v335_v32 = vpop.permute.xlu1 %334 }
  0x92   : > { %v368_v29 = vpop.permute.xlu0 %367 }
  0x93   : > { %576 = vmatmul.msk.bf16.vlgmr.msrb.gmra.mxu1 %vm210_vm0, %v368_v29  ;;  %590 = vmatmul.msk.bf16.vlgmr.msrb.gmra.mxu3 %vm210_vm0, %v368_v29  ;;  %v261_v30 = vpop.f32.mrf.mxu1  ;;  %v370_v40 = vpop.permute.xlu1 %369 }
  0x95   : > { %v226_v31 = vpop.f32.mrf.mxu0 }
  0x96   : > { %v262_v33 = vadd.f32 %v261_v30, %v226_v31 }
  0x98   : > { %272 = vst.msk [vmem:[%s721_s29] sm:$0xff] %vm271_vm1, %v262_v33 }
  0x99   : > { %v313_v34 = vpop.f32.mrf.mxu3 }
  0x9b   : > { %575 = vmatmul.msk.bf16.gmra.mxu0 %vm210_vm0, %v335_v32  ;;  %589 = vmatmul.msk.bf16.gmra.mxu2 %vm210_vm0, %v335_v32  ;;  %v263_v35 = vpop.f32.mrf.mxu1 }
  0x9c   : > { %v294_v36 = vpop.f32.mrf.mxu2 }
  0x9d   : > { %v314_v37 = vadd.f32 %v313_v34, %v294_v36  ;;  %v228_v38 = vpop.f32.mrf.mxu0 }
  0x9e   : > { %v264_v39 = vadd.f32 %v263_v35, %v228_v38 }
  0x9f   : > { %566 = vst.msk [vmem:[%s721_s29 + $0x20] sm:$0xff] %vm271_vm1, %v314_v37 }
  0xa0   : > { %273 = vst.msk [vmem:[%s721_s29 + $0x8] sm:$0xff] %vm271_vm1, %v264_v39 }
  0xa1   : > { %v315_v41 = vpop.f32.mrf.mxu3 }
  0xa3   : > { %577 = vmatmul.msk.bf16.gmra.mxu1 %vm210_vm0, %v370_v40  ;;  %591 = vmatmul.msk.bf16.gmra.mxu3 %vm210_vm0, %v370_v40  ;;  %v266_v42 = vpop.f32.mrf.mxu1 }
  0xa4   : > { %v296_v43 = vpop.f32.mrf.mxu2 }
  0xa5   : > { %v316_v44 = vadd.f32 %v315_v41, %v296_v43  ;;  %v231_v45 = vpop.f32.mrf.mxu0 }
  0xa6   : > { %v267_v46 = vadd.f32 %v266_v42, %v231_v45 }
  0xa7   : > { %567 = vst.msk [vmem:[%s721_s29 + $0x28] sm:$0xff] %vm271_vm1, %v316_v44 }
  0xa8   : > { %274 = vst.msk [vmem:[%s721_s29 + $0x10] sm:$0xff] %vm271_vm1, %v267_v46 }
  0xa9   : > { %v318_v47 = vpop.f32.mrf.mxu3 }
  0xab   : > { %v268_v48 = vpop.f32.mrf.mxu1 }
  0xac   : > { %v299_v49 = vpop.f32.mrf.mxu2 }
  0xad   : > { %v319_v50 = vadd.f32 %v318_v47, %v299_v49  ;;  %v233_v51 = vpop.f32.mrf.mxu0 }
  0xae   : > { %v269_v52 = vadd.f32 %v268_v48, %v233_v51 }
  0xaf   : > { %568 = vst.msk [vmem:[%s721_s29 + $0x30] sm:$0xff] %vm271_vm1, %v319_v50 }
  0xb0   : > { %275 = vst.msk [vmem:[%s721_s29 + $0x18] sm:$0xff] %vm271_vm1, %v269_v52 }
  0xb1   : > { %v320_v53 = vpop.f32.mrf.mxu3 }
  0xb4   : > { %v301_v54 = vpop.f32.mrf.mxu2 }
  0xb5   : > { %v321_v55 = vadd.f32 %v320_v53, %v301_v54 }
  0xb7   : > { %569 = vst.msk [vmem:[%s721_s29 + $0x38] sm:$0xff] %vm271_vm1, %v321_v55 }
 0x108   : > { %v357_v56 = vpop.f32.mrf.mxu0 }
 0x10e   : > { %v418_v57 = vpop.f32.mrf.mxu2 }
 0x110   : > { %v386_v58 = vpop.f32.mrf.mxu1  ;;  %v359_v60 = vpop.f32.mrf.mxu0 }
 0x111   : > { %v387_v59 = vadd.f32 %v386_v58, %v357_v56 }
 0x113   : > { %578 = vst.msk [vmem:[%s721_s29 + $0x40] sm:$0xff] %vm271_vm1, %v387_v59 }
 0x116   : > { %v437_v61 = vpop.f32.mrf.mxu3  ;;  %v420_v1 = vpop.f32.mrf.mxu2 }
 0x117   : > { %v438_v62 = vadd.f32 %v437_v61, %v418_v57 }
 0x118   : > { %v388_v63 = vpop.f32.mrf.mxu1  ;;  %v362_v2 = vpop.f32.mrf.mxu0 }
 0x119   : > { %592 = vst.msk [vmem:[%s721_s29 + $0x60] sm:$0xff] %vm271_vm1, %v438_v62  ;;  %v389_v0 = vadd.f32 %v388_v63, %v359_v60 }
 0x11b   : > { %579 = vst.msk [vmem:[%s721_s29 + $0x48] sm:$0xff] %vm271_vm1, %v389_v0 }
 0x11e   : > { %v439_v3 = vpop.f32.mrf.mxu3  ;;  %v423_v7 = vpop.f32.mrf.mxu2 }
 0x11f   : > { %v440_v4 = vadd.f32 %v439_v3, %v420_v1 }
 0x120   : > { %v391_v5 = vpop.f32.mrf.mxu1  ;;  %v364_v10 = vpop.f32.mrf.mxu0 }
 0x121   : > { %593 = vst.msk [vmem:[%s721_s29 + $0x68] sm:$0xff] %vm271_vm1, %v440_v4  ;;  %v392_v6 = vadd.f32 %v391_v5, %v362_v2 }
 0x123   : > { %580 = vst.msk [vmem:[%s721_s29 + $0x50] sm:$0xff] %vm271_vm1, %v392_v6 }
 0x126   : > { %v442_v8 = vpop.f32.mrf.mxu3  ;;  %v425_v13 = vpop.f32.mrf.mxu2 }
 0x127   : > { %v443_v9 = vadd.f32 %v442_v8, %v423_v7 }
 0x128   : > { %v393_v11 = vpop.f32.mrf.mxu1 }
 0x129   : > { %594 = vst.msk [vmem:[%s721_s29 + $0x70] sm:$0xff] %vm271_vm1, %v443_v9  ;;  %v394_v12 = vadd.f32 %v393_v11, %v364_v10 }
 0x12b   : > { %581 = vst.msk [vmem:[%s721_s29 + $0x58] sm:$0xff] %vm271_vm1, %v394_v12 }
 0x12e   : > { %v444_v14 = vpop.f32.mrf.mxu3 }
 0x12f   : > { %v445_v15 = vadd.f32 %v444_v14, %v425_v13 }
 0x131   : > { %595 = vst.msk [vmem:[%s721_s29 + $0x78] sm:$0xff] %vm271_vm1, %v445_v15 }
 0x132 PF: > { %s12_s11 = sadd.s32 1, %s651_s11   ;;  %s771_s9 = smov %s647_s10 }
 0x133   : > { %p9_p5 = scmp.ge.s32.totalorder %s12_s11, 4   ;;  %s772_s10 = smov %s774_s12 }
 0x135   :  { %11 = sbr.rel (!%p9_p5) target bundleno = 2 (0x2), region = 62 }

</bundles_post_ra>
